<compile_context>
chip_gen: v7x
topology: tpu7x:2x2x1
jax: 0.10.0
libtpu: 0.0.40
codegen_flags: <defaults>
</compile_context>

<pallas_src>
import jax
import jax.numpy as jnp
from jax.experimental import pallas as pl
from jax.experimental.pallas import tpu as pltpu


def _round_up(n, m):
    return ((n + m - 1) // m) * m


def _autoencoder_kernel(x_ref, *refs):
    # refs = (w1, b1, w2, b2, ..., w8, b8, out_ref); all feature dims 128-padded.
    out_ref = refs[-1]
    param_refs = refs[:-1]
    n_layers = len(param_refs) // 2

    h = x_ref[...]                                   # (bb, in_pad) compute dtype
    for layer in range(n_layers):
        w = param_refs[2 * layer][...]               # (in_pad, out_pad) compute dtype
        b = param_refs[2 * layer + 1][...]           # (1, out_pad) float32
        acc = jnp.dot(h, w, preferred_element_type=jnp.float32) + b
        if layer < n_layers - 1:
            acc = jnp.maximum(acc, 0.0)              # ReLU (keeps padded lanes at 0)
            h = acc.astype(w.dtype)                  # downcast for next MXU pass (no-op in f32)
        else:
            h = jax.nn.sigmoid(acc)                  # final Sigmoid, stays f32
    out_ref[...] = h.astype(out_ref.dtype)


def autoencoder_forward(x, params, *, block_batch=None, compute_dtype=jnp.float32):
    """x: (B, input_size) float32; params: list of (W(in,out), b(out,)) pairs.

    Pads batch and every feature dim (to 128 lanes) internally; returns the
    (B, input_size) result in x.dtype.
    """
    B, input_size = x.shape
    out_features = params[-1][0].shape[1]

    in_pad = _round_up(input_size, 128)
    out_pad = _round_up(out_features, 128)

    # Batch tile: multiple of 8, aim for >= ~8 grid steps when B is large,
    # capped so double-buffered x/out blocks stay well inside scoped VMEM
    # (128 f32 lanes x 1024 rows x 2 arrays x 2 buffers = 2 MiB).
    if block_batch is None:
        block_batch = max(8, min(1024, _round_up(pl.cdiv(B, 8), 8)))
    block_batch = _round_up(block_batch, 8)
    B_pad = _round_up(B, block_batch)

    x_p = jnp.pad(x.astype(compute_dtype),
                  ((0, B_pad - B), (0, in_pad - input_size)))

    flat = []
    # Only x / out index_maps vary with the grid step; weights stay resident.
    in_specs = [pl.BlockSpec((block_batch, in_pad), lambda i: (i, 0))]
    for (w, b) in params:
        wi, wo = w.shape
        wi_p, wo_p = _round_up(wi, 128), _round_up(wo, 128)
        w_p = jnp.pad(w, ((0, wi_p - wi), (0, wo_p - wo))).astype(compute_dtype)
        b_p = jnp.pad(b, (0, wo_p - wo)).reshape(1, wo_p).astype(jnp.float32)
        flat.append(w_p)
        flat.append(b_p)
        in_specs.append(pl.BlockSpec((wi_p, wo_p), lambda i: (0, 0)))
        in_specs.append(pl.BlockSpec((1, wo_p), lambda i: (0, 0)))

    out_spec = pl.BlockSpec((block_batch, out_pad), lambda i: (i, 0))

    out_p = pl.pallas_call(
        _autoencoder_kernel,
        out_shape=jax.ShapeDtypeStruct((B_pad, out_pad), x.dtype),
        grid_spec=pl.GridSpec(
            grid=(B_pad // block_batch,),
            in_specs=in_specs,
            out_specs=out_spec,
        ),
        compiler_params=pltpu.CompilerParams(
            dimension_semantics=("parallel",)),
    )(x_p, *flat)

    # Padded lanes hold sigmoid(0)=0.5 and padded rows are garbage-free zeros'
    # images; discard both by slicing back to the logical shape.
    return out_p[:B, :input_size]


def init_autoencoder_params(key, input_size, hidden_size=25):
    """Deterministic init mirroring the PyTorch layer sizes (uniform fan-in)."""
    sizes = [
        input_size,
        int(hidden_size * 2),      # 50
        int(hidden_size * 1.5),    # 37
        int(hidden_size * 1.25),   # 31
        int(hidden_size),          # 25
        int(hidden_size * 1.25),   # 31
        int(hidden_size * 1.5),    # 37
        int(hidden_size * 2),      # 50
        input_size,
    ]
    params = []
    for li in range(len(sizes) - 1):
        fan_in, fan_out = sizes[li], sizes[li + 1]
        key, kw, kb = jax.random.split(key, 3)
        bound = 1.0 / (fan_in ** 0.5)
        w = jax.random.uniform(kw, (fan_in, fan_out), jnp.float32, -bound, bound)
        b = jax.random.uniform(kb, (fan_out,), jnp.float32, -bound, bound)
        params.append((w, b))
    return params


def _reference_forward(x, params):
    h = x
    for i, (w, b) in enumerate(params):
        h = h @ w + b
        h = jnp.maximum(h, 0.0) if i < len(params) - 1 else jax.nn.sigmoid(h)
    return h


if __name__ == "__main__":
    key = jax.random.PRNGKey(0)
    kx, kp = jax.random.split(key)

    batch = 64          # small, but gives grid=(8,) with the default block_batch=8
    input_size = 64
    hidden_size = 25

    x = jax.random.uniform(kx, (batch, input_size), jnp.float32)
    params = init_autoencoder_params(kp, input_size, hidden_size)
    ref = _reference_forward(x, params)

    # f32 compute path (bit-accurate vs reference; this is the v5e path too)
    out = autoencoder_forward(x, params)
    out = jax.block_until_ready(out)
    assert out.shape == (batch, input_size)
    assert jnp.allclose(out, ref, atol=1e-5, rtol=1e-5), "mismatch vs JAX reference (f32)"

    # bf16 MXU path (v6e / v7x): same kernel, weights/activations packed to bf16.
    out_bf16 = autoencoder_forward(x, params, compute_dtype=jnp.bfloat16)
    out_bf16 = jax.block_until_ready(out_bf16)
    assert out_bf16.shape == (batch, input_size)
    assert bool(jnp.all(jnp.isfinite(out_bf16)))
    assert float(jnp.max(jnp.abs(out_bf16 - ref))) < 0.1, "bf16 path diverged"

    print("KERNEL_OK")
</pallas_src>

<mosaic_0001>
module attributes {stable_mosaic.version = 11 : i64} {
  func.func @_autoencoder_kernel(%arg0: i32, %arg1: memref<8x128xf32, #tpu.memory_space<vmem>>, %arg2: memref<128x128xf32, #tpu.memory_space<vmem>>, %arg3: memref<1x128xf32, #tpu.memory_space<vmem>>, %arg4: memref<128x128xf32, #tpu.memory_space<vmem>>, %arg5: memref<1x128xf32, #tpu.memory_space<vmem>>, %arg6: memref<128x128xf32, #tpu.memory_space<vmem>>, %arg7: memref<1x128xf32, #tpu.memory_space<vmem>>, %arg8: memref<128x128xf32, #tpu.memory_space<vmem>>, %arg9: memref<1x128xf32, #tpu.memory_space<vmem>>, %arg10: memref<128x128xf32, #tpu.memory_space<vmem>>, %arg11: memref<1x128xf32, #tpu.memory_space<vmem>>, %arg12: memref<128x128xf32, #tpu.memory_space<vmem>>, %arg13: memref<1x128xf32, #tpu.memory_space<vmem>>, %arg14: memref<128x128xf32, #tpu.memory_space<vmem>>, %arg15: memref<1x128xf32, #tpu.memory_space<vmem>>, %arg16: memref<128x128xf32, #tpu.memory_space<vmem>>, %arg17: memref<1x128xf32, #tpu.memory_space<vmem>>, %arg18: memref<8x128xf32, #tpu.memory_space<vmem>>) attributes {dimension_semantics = [#tpu.dimension_semantics<parallel>], iteration_bounds = array<i64: 8>, scalar_prefetch = 0 : i64, scratch_operands = 0 : i64, tpu.core_type = #tpu.core_type<tc>, window_params = [{transform_indices = @transform_0, window_bounds = array<i64: 8, 128>}, {pipeline_mode = #tpu.pipeline_mode<synchronous>, transform_indices = @transform_1, window_bounds = array<i64: 128, 128>}, {pipeline_mode = #tpu.pipeline_mode<synchronous>, transform_indices = @transform_2, window_bounds = array<i64: 1, 128>}, {pipeline_mode = #tpu.pipeline_mode<synchronous>, transform_indices = @transform_3, window_bounds = array<i64: 128, 128>}, {pipeline_mode = #tpu.pipeline_mode<synchronous>, transform_indices = @transform_4, window_bounds = array<i64: 1, 128>}, {pipeline_mode = #tpu.pipeline_mode<synchronous>, transform_indices = @transform_5, window_bounds = array<i64: 128, 128>}, {pipeline_mode = #tpu.pipeline_mode<synchronous>, transform_indices = @transform_6, window_bounds = array<i64: 1, 128>}, {pipeline_mode = #tpu.pipeline_mode<synchronous>, transform_indices = @transform_7, window_bounds = array<i64: 128, 128>}, {pipeline_mode = #tpu.pipeline_mode<synchronous>, transform_indices = @transform_8, window_bounds = array<i64: 1, 128>}, {pipeline_mode = #tpu.pipeline_mode<synchronous>, transform_indices = @transform_9, window_bounds = array<i64: 128, 128>}, {pipeline_mode = #tpu.pipeline_mode<synchronous>, transform_indices = @transform_10, window_bounds = array<i64: 1, 128>}, {pipeline_mode = #tpu.pipeline_mode<synchronous>, transform_indices = @transform_11, window_bounds = array<i64: 128, 128>}, {pipeline_mode = #tpu.pipeline_mode<synchronous>, transform_indices = @transform_12, window_bounds = array<i64: 1, 128>}, {pipeline_mode = #tpu.pipeline_mode<synchronous>, transform_indices = @transform_13, window_bounds = array<i64: 128, 128>}, {pipeline_mode = #tpu.pipeline_mode<synchronous>, transform_indices = @transform_14, window_bounds = array<i64: 1, 128>}, {pipeline_mode = #tpu.pipeline_mode<synchronous>, transform_indices = @transform_15, window_bounds = array<i64: 128, 128>}, {pipeline_mode = #tpu.pipeline_mode<synchronous>, transform_indices = @transform_16, window_bounds = array<i64: 1, 128>}, {transform_indices = @transform_17, window_bounds = array<i64: 8, 128>}]} {
    %c0 = arith.constant 0 : index
    %c0_0 = arith.constant 0 : index
    %0 = vector.load %arg1[%c0, %c0_0] : memref<8x128xf32, #tpu.memory_space<vmem>>, vector<8x128xf32>
    %c0_1 = arith.constant 0 : index
    %c0_2 = arith.constant 0 : index
    %1 = vector.load %arg2[%c0_1, %c0_2] : memref<128x128xf32, #tpu.memory_space<vmem>>, vector<128x128xf32>
    %c0_3 = arith.constant 0 : index
    %c0_4 = arith.constant 0 : index
    %2 = vector.load %arg3[%c0_3, %c0_4] : memref<1x128xf32, #tpu.memory_space<vmem>>, vector<1x128xf32>
    %cst = arith.constant dense<0.000000e+00> : vector<8x128xf32>
    %3 = tpu.matmul %0, %1, %cst {dimension_numbers = #tpu.dot_dimension_numbers<[1], [0], [0], [1], [0, 0, 1, 1], [], []>} : vector<8x128xf32>, vector<128x128xf32>, vector<8x128xf32> -> vector<8x128xf32>
    %4 = vector.broadcast %2 : vector<1x128xf32> to vector<8x128xf32>
    %5 = arith.addf %3, %4 : vector<8x128xf32>
    %cst_5 = arith.constant 0.000000e+00 : f32
    %6 = vector.broadcast %cst_5 : f32 to vector<8x128xf32>
    %7 = arith.maximumf %5, %6 : vector<8x128xf32>
    %c0_6 = arith.constant 0 : index
    %c0_7 = arith.constant 0 : index
    %8 = vector.load %arg4[%c0_6, %c0_7] : memref<128x128xf32, #tpu.memory_space<vmem>>, vector<128x128xf32>
    %c0_8 = arith.constant 0 : index
    %c0_9 = arith.constant 0 : index
    %9 = vector.load %arg5[%c0_8, %c0_9] : memref<1x128xf32, #tpu.memory_space<vmem>>, vector<1x128xf32>
    %cst_10 = arith.constant dense<0.000000e+00> : vector<8x128xf32>
    %10 = tpu.matmul %7, %8, %cst_10 {dimension_numbers = #tpu.dot_dimension_numbers<[1], [0], [0], [1], [0, 0, 1, 1], [], []>} : vector<8x128xf32>, vector<128x128xf32>, vector<8x128xf32> -> vector<8x128xf32>
    %11 = vector.broadcast %9 : vector<1x128xf32> to vector<8x128xf32>
    %12 = arith.addf %10, %11 : vector<8x128xf32>
    %cst_11 = arith.constant 0.000000e+00 : f32
    %13 = vector.broadcast %cst_11 : f32 to vector<8x128xf32>
    %14 = arith.maximumf %12, %13 : vector<8x128xf32>
    %c0_12 = arith.constant 0 : index
    %c0_13 = arith.constant 0 : index
    %15 = vector.load %arg6[%c0_12, %c0_13] : memref<128x128xf32, #tpu.memory_space<vmem>>, vector<128x128xf32>
    %c0_14 = arith.constant 0 : index
    %c0_15 = arith.constant 0 : index
    %16 = vector.load %arg7[%c0_14, %c0_15] : memref<1x128xf32, #tpu.memory_space<vmem>>, vector<1x128xf32>
    %cst_16 = arith.constant dense<0.000000e+00> : vector<8x128xf32>
    %17 = tpu.matmul %14, %15, %cst_16 {dimension_numbers = #tpu.dot_dimension_numbers<[1], [0], [0], [1], [0, 0, 1, 1], [], []>} : vector<8x128xf32>, vector<128x128xf32>, vector<8x128xf32> -> vector<8x128xf32>
    %18 = vector.broadcast %16 : vector<1x128xf32> to vector<8x128xf32>
    %19 = arith.addf %17, %18 : vector<8x128xf32>
    %cst_17 = arith.constant 0.000000e+00 : f32
    %20 = vector.broadcast %cst_17 : f32 to vector<8x128xf32>
    %21 = arith.maximumf %19, %20 : vector<8x128xf32>
    %c0_18 = arith.constant 0 : index
    %c0_19 = arith.constant 0 : index
    %22 = vector.load %arg8[%c0_18, %c0_19] : memref<128x128xf32, #tpu.memory_space<vmem>>, vector<128x128xf32>
    %c0_20 = arith.constant 0 : index
    %c0_21 = arith.constant 0 : index
    %23 = vector.load %arg9[%c0_20, %c0_21] : memref<1x128xf32, #tpu.memory_space<vmem>>, vector<1x128xf32>
    %cst_22 = arith.constant dense<0.000000e+00> : vector<8x128xf32>
    %24 = tpu.matmul %21, %22, %cst_22 {dimension_numbers = #tpu.dot_dimension_numbers<[1], [0], [0], [1], [0, 0, 1, 1], [], []>} : vector<8x128xf32>, vector<128x128xf32>, vector<8x128xf32> -> vector<8x128xf32>
    %25 = vector.broadcast %23 : vector<1x128xf32> to vector<8x128xf32>
    %26 = arith.addf %24, %25 : vector<8x128xf32>
    %cst_23 = arith.constant 0.000000e+00 : f32
    %27 = vector.broadcast %cst_23 : f32 to vector<8x128xf32>
    %28 = arith.maximumf %26, %27 : vector<8x128xf32>
    %c0_24 = arith.constant 0 : index
    %c0_25 = arith.constant 0 : index
    %29 = vector.load %arg10[%c0_24, %c0_25] : memref<128x128xf32, #tpu.memory_space<vmem>>, vector<128x128xf32>
    %c0_26 = arith.constant 0 : index
    %c0_27 = arith.constant 0 : index
    %30 = vector.load %arg11[%c0_26, %c0_27] : memref<1x128xf32, #tpu.memory_space<vmem>>, vector<1x128xf32>
    %cst_28 = arith.constant dense<0.000000e+00> : vector<8x128xf32>
    %31 = tpu.matmul %28, %29, %cst_28 {dimension_numbers = #tpu.dot_dimension_numbers<[1], [0], [0], [1], [0, 0, 1, 1], [], []>} : vector<8x128xf32>, vector<128x128xf32>, vector<8x128xf32> -> vector<8x128xf32>
    %32 = vector.broadcast %30 : vector<1x128xf32> to vector<8x128xf32>
    %33 = arith.addf %31, %32 : vector<8x128xf32>
    %cst_29 = arith.constant 0.000000e+00 : f32
    %34 = vector.broadcast %cst_29 : f32 to vector<8x128xf32>
    %35 = arith.maximumf %33, %34 : vector<8x128xf32>
    %c0_30 = arith.constant 0 : index
    %c0_31 = arith.constant 0 : index
    %36 = vector.load %arg12[%c0_30, %c0_31] : memref<128x128xf32, #tpu.memory_space<vmem>>, vector<128x128xf32>
    %c0_32 = arith.constant 0 : index
    %c0_33 = arith.constant 0 : index
    %37 = vector.load %arg13[%c0_32, %c0_33] : memref<1x128xf32, #tpu.memory_space<vmem>>, vector<1x128xf32>
    %cst_34 = arith.constant dense<0.000000e+00> : vector<8x128xf32>
    %38 = tpu.matmul %35, %36, %cst_34 {dimension_numbers = #tpu.dot_dimension_numbers<[1], [0], [0], [1], [0, 0, 1, 1], [], []>} : vector<8x128xf32>, vector<128x128xf32>, vector<8x128xf32> -> vector<8x128xf32>
    %39 = vector.broadcast %37 : vector<1x128xf32> to vector<8x128xf32>
    %40 = arith.addf %38, %39 : vector<8x128xf32>
    %cst_35 = arith.constant 0.000000e+00 : f32
    %41 = vector.broadcast %cst_35 : f32 to vector<8x128xf32>
    %42 = arith.maximumf %40, %41 : vector<8x128xf32>
    %c0_36 = arith.constant 0 : index
    %c0_37 = arith.constant 0 : index
    %43 = vector.load %arg14[%c0_36, %c0_37] : memref<128x128xf32, #tpu.memory_space<vmem>>, vector<128x128xf32>
    %c0_38 = arith.constant 0 : index
    %c0_39 = arith.constant 0 : index
    %44 = vector.load %arg15[%c0_38, %c0_39] : memref<1x128xf32, #tpu.memory_space<vmem>>, vector<1x128xf32>
    %cst_40 = arith.constant dense<0.000000e+00> : vector<8x128xf32>
    %45 = tpu.matmul %42, %43, %cst_40 {dimension_numbers = #tpu.dot_dimension_numbers<[1], [0], [0], [1], [0, 0, 1, 1], [], []>} : vector<8x128xf32>, vector<128x128xf32>, vector<8x128xf32> -> vector<8x128xf32>
    %46 = vector.broadcast %44 : vector<1x128xf32> to vector<8x128xf32>
    %47 = arith.addf %45, %46 : vector<8x128xf32>
    %cst_41 = arith.constant 0.000000e+00 : f32
    %48 = vector.broadcast %cst_41 : f32 to vector<8x128xf32>
    %49 = arith.maximumf %47, %48 : vector<8x128xf32>
    %c0_42 = arith.constant 0 : index
    %c0_43 = arith.constant 0 : index
    %50 = vector.load %arg16[%c0_42, %c0_43] : memref<128x128xf32, #tpu.memory_space<vmem>>, vector<128x128xf32>
    %c0_44 = arith.constant 0 : index
    %c0_45 = arith.constant 0 : index
    %51 = vector.load %arg17[%c0_44, %c0_45] : memref<1x128xf32, #tpu.memory_space<vmem>>, vector<1x128xf32>
    %cst_46 = arith.constant dense<0.000000e+00> : vector<8x128xf32>
    %52 = tpu.matmul %49, %50, %cst_46 {dimension_numbers = #tpu.dot_dimension_numbers<[1], [0], [0], [1], [0, 0, 1, 1], [], []>} : vector<8x128xf32>, vector<128x128xf32>, vector<8x128xf32> -> vector<8x128xf32>
    %53 = vector.broadcast %51 : vector<1x128xf32> to vector<8x128xf32>
    %54 = arith.addf %52, %53 : vector<8x128xf32>
    %55 = arith.negf %54 : vector<8x128xf32>
    %56 = math.exp %55 : vector<8x128xf32>
    %cst_47 = arith.constant 1.000000e+00 : f32
    %57 = vector.broadcast %cst_47 : f32 to vector<8x128xf32>
    %58 = arith.addf %57, %56 : vector<8x128xf32>
    %59 = arith.divf %57, %58 : vector<8x128xf32>
    %c0_48 = arith.constant 0 : index
    %c0_49 = arith.constant 0 : index
    %60 = vector.load %arg18[%c0_48, %c0_49] : memref<8x128xf32, #tpu.memory_space<vmem>>, vector<8x128xf32>
    tpu.vector_store %arg18[%c0_48, %c0_49], %59 {strides = array<i32>} : memref<8x128xf32, #tpu.memory_space<vmem>>, vector<8x128xf32>,
    return
  }
  func.func @transform_0(%arg0: i32) -> (i32, i32) {
    %c0_i32 = arith.constant 0 : i32
    %c0_i32_0 = arith.constant 0 : i32
    return %arg0, %c0_i32 : i32, i32
  }
  func.func @transform_1(%arg0: i32) -> (i32, i32) {
    %c0_i32 = arith.constant 0 : i32
    %c0_i32_0 = arith.constant 0 : i32
    %c0_i32_1 = arith.constant 0 : i32
    return %c0_i32, %c0_i32_0 : i32, i32
  }
  func.func @transform_2(%arg0: i32) -> (i32, i32) {
    %c0_i32 = arith.constant 0 : i32
    %c0_i32_0 = arith.constant 0 : i32
    %c0_i32_1 = arith.constant 0 : i32
    return %c0_i32, %c0_i32_0 : i32, i32
  }
  func.func @transform_3(%arg0: i32) -> (i32, i32) {
    %c0_i32 = arith.constant 0 : i32
    %c0_i32_0 = arith.constant 0 : i32
    %c0_i32_1 = arith.constant 0 : i32
    return %c0_i32, %c0_i32_0 : i32, i32
  }
  func.func @transform_4(%arg0: i32) -> (i32, i32) {
    %c0_i32 = arith.constant 0 : i32
    %c0_i32_0 = arith.constant 0 : i32
    %c0_i32_1 = arith.constant 0 : i32
    return %c0_i32, %c0_i32_0 : i32, i32
  }
  func.func @transform_5(%arg0: i32) -> (i32, i32) {
    %c0_i32 = arith.constant 0 : i32
    %c0_i32_0 = arith.constant 0 : i32
    %c0_i32_1 = arith.constant 0 : i32
    return %c0_i32, %c0_i32_0 : i32, i32
  }
  func.func @transform_6(%arg0: i32) -> (i32, i32) {
    %c0_i32 = arith.constant 0 : i32
    %c0_i32_0 = arith.constant 0 : i32
    %c0_i32_1 = arith.constant 0 : i32
    return %c0_i32, %c0_i32_0 : i32, i32
  }
  func.func @transform_7(%arg0: i32) -> (i32, i32) {
    %c0_i32 = arith.constant 0 : i32
    %c0_i32_0 = arith.constant 0 : i32
    %c0_i32_1 = arith.constant 0 : i32
    return %c0_i32, %c0_i32_0 : i32, i32
  }
  func.func @transform_8(%arg0: i32) -> (i32, i32) {
    %c0_i32 = arith.constant 0 : i32
    %c0_i32_0 = arith.constant 0 : i32
    %c0_i32_1 = arith.constant 0 : i32
    return %c0_i32, %c0_i32_0 : i32, i32
  }
  func.func @transform_9(%arg0: i32) -> (i32, i32) {
    %c0_i32 = arith.constant 0 : i32
    %c0_i32_0 = arith.constant 0 : i32
    %c0_i32_1 = arith.constant 0 : i32
    return %c0_i32, %c0_i32_0 : i32, i32
  }
  func.func @transform_10(%arg0: i32) -> (i32, i32) {
    %c0_i32 = arith.constant 0 : i32
    %c0_i32_0 = arith.constant 0 : i32
    %c0_i32_1 = arith.constant 0 : i32
    return %c0_i32, %c0_i32_0 : i32, i32
  }
  func.func @transform_11(%arg0: i32) -> (i32, i32) {
    %c0_i32 = arith.constant 0 : i32
    %c0_i32_0 = arith.constant 0 : i32
    %c0_i32_1 = arith.constant 0 : i32
    return %c0_i32, %c0_i32_0 : i32, i32
  }
  func.func @transform_12(%arg0: i32) -> (i32, i32) {
    %c0_i32 = arith.constant 0 : i32
    %c0_i32_0 = arith.constant 0 : i32
    %c0_i32_1 = arith.constant 0 : i32
    return %c0_i32, %c0_i32_0 : i32, i32
  }
  func.func @transform_13(%arg0: i32) -> (i32, i32) {
    %c0_i32 = arith.constant 0 : i32
    %c0_i32_0 = arith.constant 0 : i32
    %c0_i32_1 = arith.constant 0 : i32
    return %c0_i32, %c0_i32_0 : i32, i32
  }
  func.func @transform_14(%arg0: i32) -> (i32, i32) {
    %c0_i32 = arith.constant 0 : i32
    %c0_i32_0 = arith.constant 0 : i32
    %c0_i32_1 = arith.constant 0 : i32
    return %c0_i32, %c0_i32_0 : i32, i32
  }
  func.func @transform_15(%arg0: i32) -> (i32, i32) {
    %c0_i32 = arith.constant 0 : i32
    %c0_i32_0 = arith.constant 0 : i32
    %c0_i32_1 = arith.constant 0 : i32
    return %c0_i32, %c0_i32_0 : i32, i32
  }
  func.func @transform_16(%arg0: i32) -> (i32, i32) {
    %c0_i32 = arith.constant 0 : i32
    %c0_i32_0 = arith.constant 0 : i32
    %c0_i32_1 = arith.constant 0 : i32
    return %c0_i32, %c0_i32_0 : i32, i32
  }
  func.func @transform_17(%arg0: i32) -> (i32, i32) {
    %c0_i32 = arith.constant 0 : i32
    %c0_i32_0 = arith.constant 0 : i32
    return %arg0, %c0_i32 : i32, i32
  }
}

</mosaic_0001>

<bundles_post_ra>
// kernel: tpu_custom_call.1
= control target key start
LH: loop header
LB: loop body
LE: loop exit
PB: predicated region body
PF: predicated region fallthrough
CT: control target
= control target key end

     0   :  { %s3316_s0 = inlined_call_operand.hbm [shape: f32[64,128], index: 0, kind: input, shape index: {}]   ;;  %s3317_s1 = inlined_call_operand.hbm [shape: f32[128,128], index: 1, kind: input, shape index: {}]   ;;  %s3318_s2 = inlined_call_operand.vmem [shape: f32[1,128], index: 2, kind: input, shape index: {}]   ;;  %s3319_s3 = inlined_call_operand.hbm [shape: f32[128,128], index: 3, kind: input, shape index: {}]   ;;  %s3320_s4 = inlined_call_operand.vmem [shape: f32[1,128], index: 4, kind: input, shape index: {}]   ;;  %s3321_s5 = inlined_call_operand.hbm [shape: f32[128,128], index: 5, kind: input, shape index: {}]   ;;  %s3322_s6 = inlined_call_operand.vmem [shape: f32[1,128], index: 6, kind: input, shape index: {}]   ;;  %s3323_s7 = inlined_call_operand.hbm [shape: f32[128,128], index: 7, kind: input, shape index: {}]   ;;  %s3324_s8 = inlined_call_operand.vmem [shape: f32[1,128], index: 8, kind: input, shape index: {}]   ;;  %s3325_s9 = inlined_call_operand.hbm [shape: f32[128,128], index: 9, kind: input, shape index: {}]   ;;  %s3326_s10 = inlined_call_operand.vmem [shape: f32[1,128], index: 10, kind: input, shape index: {}]   ;;  %s3327_s11 = inlined_call_operand.hbm [shape: f32[128,128], index: 11, kind: input, shape index: {}]   ;;  %s3328_s12 = inlined_call_operand.vmem [shape: f32[1,128], index: 12, kind: input, shape index: {}]   ;;  %s3329_s13 = inlined_call_operand.hbm [shape: f32[128,128], index: 13, kind: input, shape index: {}]   ;;  %s3330_s14 = inlined_call_operand.vmem [shape: f32[1,128], index: 14, kind: input, shape index: {}]   ;;  %s3331_s15 = inlined_call_operand.hbm [shape: f32[128,128], index: 15, kind: input, shape index: {}]   ;;  %s3332_s16 = inlined_call_operand.vmem [shape: f32[1,128], index: 16, kind: input, shape index: {}]   ;;  %s3333_s17 = inlined_call_operand.hbm [shape: f32[64,128], index: 17, kind: output, shape index: {}]  }
   0x1   :  { %3340 = sst [smem:[#allocation24_spill]] %s3316_s0 }
   0x2   :  { %3341 = sst [smem:[#allocation25_spill]] %s3317_s1 }
   0x3   :  { %3342 = sst [smem:[#allocation26_spill]] %s3319_s3 }
   0x4   :  { %3343 = sst [smem:[#allocation27_spill]] %s3320_s4 }
   0x5   :  { %3344 = sst [smem:[#allocation28_spill]] %s3321_s5 }
   0x6   :  { %3345 = sst [smem:[#allocation29_spill]] %s3322_s6 }
   0x7   :  { %3346 = sst [smem:[#allocation30_spill]] %s3324_s8 }
   0x8   :  { %3347 = sst [smem:[#allocation31_spill]] %s3326_s10 }
   0x9   :  { %3348 = sst [smem:[#allocation32_spill]] %s3328_s12 }
   0xa   :  { %3349 = sst [smem:[#allocation33_spill]] %s3330_s14 }
   0xb   :  { %3350 = sst [smem:[#allocation34_spill]] %s3332_s16 }
   0xc   :  { %3351 = sst [smem:[#allocation35_spill]] %s3333_s17 }
   0xd   :  { %22 = vsyncpa [#allocation3], 0 }
   0xe   :  { %24 = vsyncpa [#allocation3 + $0x1], 0 }
   0xf   :  { %25 = vsyncpa [#allocation6], 0 }
  0x10   :  { %26 = vsyncpa [#allocation9], 0 }
  0x11   :  { %27 = vsyncpa [#allocation12], 0 }
  0x12   :  { %28 = vsyncpa [#allocation15], 0 }
  0x13   :  { %29 = vsyncpa [#allocation4], 0 }
  0x14   :  { %31 = vsyncpa [#allocation4 + $0x1], 0  ;;  %s2823_s24 = smov 0   ;;  %s2825_s25 = smov 0  }
  0x15   :  { %s2827_s26 = smov 0   ;;  %s2829_s27 = smov 0  }
  0x16 LB: > { %s2718_s28 = smov [#allocation5]   ;;  %s2844_s0 = sadd.s32 4294967295, %s2716_s27   ;;  %s2716_s27 = sphi %s2829_s27, %s3387_s27   ;;  %s2712_s26 = sphi %s2827_s26, %s3386_s26   ;;  %s2708_s25 = sphi %s2825_s25, %s3385_s25   ;;  %s2704_s24 = sphi %s2823_s24, %s3384_s24  }
  0x17   : > { %s442_s29 = sshll.u32 %s2718_s28, 4  ;;  %p1600_p0 = scmp.ge.s32.totalorder %s2716_s27, 1  ;;  %s2849_s29 = int_to_ptr.vmem [resolvable:$true] %s442_s29 }
  0x18   : > { %p3337_p1 = scmp.eq.s32.totalorder %s2844_s0, 0  ;;  %p430_p2 = scmp.lt.s32.totalorder %s2716_s27, 9 }
  0x19   : > { %s2719_s18 = smov [#allocation8]   ;;  %s2720_s20 = smov [#allocation11]  }
  0x1a   : > { %p2851_p3 = pnand %p1600_p0, %p430_p2  ;;  %s474_s19 = sshll.u32 %s2719_s18, 4  ;;  %s2863_s19 = int_to_ptr.vmem [resolvable:$true] %s474_s19 }
  0x1b   : > { %s506_s21 = sshll.u32 %s2720_s20, 4  ;;  %s3354_s28 = sld [smem:[#allocation25_spill]]  ;;  %s2865_s21 = int_to_ptr.vmem [resolvable:$true] %s506_s21 }
  0x1c   : > { %s3352_s30 = scalar_select %p2851_p3, 1, 0 }
  0x1d   : > { %p2280_p4 = pneg %p2851_p3 }
  0x1f   : > { %p2859_p5 = pnand %p2280_p4, %p3337_p1 }
  0x21   : > { %s2380_s17 = scalar_lea.hbm %s3354_s28, 2048  ;;  %p2875_p7 = pneg %p2859_p5 }
  0x22   : > { %p2381_p6 = scmp.ne.s32.totalorder %s3354_s28, %s2380_s17  ;;  %p2387_p10 = scmp.lt.u32.totalorder %s2380_s17, %s3354_s28 }
  0x24   : > { %p2383_p8 = pnand %p2875_p7, %p2381_p6 }
  0x26   : > { %p2384_p9 = pneg %p2383_p8 }
  0x28   : > { %p2389_p11 = pnand %p2387_p10, %p2384_p9 }
  0x2a   : > { %2392 = shalt.err (!%p2389_p11)
}
  0x2b   : > { %s2393_s14 = scalar_lea.vmem %s2849_s29, 2048  ;;  %p2401_p2 = scmp.lt.s32.totalorder %s2849_s29, %s2849_s29 }
  0x2c   : > { %p2394_p12 = scmp.ne.s32.totalorder %s2849_s29, %s2393_s14  ;;  %p2402_p4 = scmp.lt.s32.totalorder %s2393_s14, %s2393_s14 }
  0x2e   : > { %p2396_p13 = pnand %p2394_p12, %p2875_p7  ;;  %p2403_p6 = por %p2402_p4, %p2401_p2 }
  0x30   : > { %p2397_p0 = pneg %p2396_p13 }
  0x32   : > { %p2404_p8 = pnand %p2403_p6, %p2397_p0 }
  0x34   : > { %2407 = shalt.err (!%p2404_p8)
}
  0x35   : > { %s2721_s16 = smov 128   ;;  %s2722_s12 = smov 8  }
  0x36   : > { %2283 = dma.hbm_to_vmem [thread:$0]  (!%p2859_p5), %s3354_s28, 2048, %s2849_s29, [#allocation6], %s2721_s16, %s2721_s16, %s2722_s12  }
  0x37   : > { %s3356_s5 = sld [smem:[#allocation28_spill]] }
  0x3d   : > { %s2408_s14 = scalar_lea.hbm %s3356_s5, 2048 }
  0x3e   : > { %p2409_p9 = scmp.ne.s32.totalorder %s3356_s5, %s2408_s14  ;;  %p2415_p12 = scmp.lt.u32.totalorder %s2408_s14, %s3356_s5 }
  0x40   : > { %p2411_p10 = pnand %p2409_p9, %p2875_p7 }
  0x42   : > { %p2412_p11 = pneg %p2411_p10 }
  0x44   : > { %p2417_p13 = pnand %p2415_p12, %p2412_p11 }
  0x46   : > { %2420 = shalt.err (!%p2417_p13)
}
  0x47   : > { %s2421_s29 = scalar_lea.vmem %s2863_s19, 2048  ;;  %p2429_p6 = scmp.lt.s32.totalorder %s2863_s19, %s2863_s19 }
  0x48   : > { %p2422_p0 = scmp.ne.s32.totalorder %s2863_s19, %s2421_s29  ;;  %p2430_p8 = scmp.lt.s32.totalorder %s2421_s29, %s2421_s29 }
  0x4a   : > { %p2424_p2 = pnand %p2422_p0, %p2875_p7  ;;  %p2431_p9 = por %p2430_p8, %p2429_p6 }
  0x4c   : > { %p2425_p4 = pneg %p2424_p2 }
  0x4e   : > { %p2432_p10 = pnand %p2431_p9, %p2425_p4 }
  0x50   : > { %2435 = shalt.err (!%p2432_p10)
}
  0x51   : > { %2289 = dma.hbm_to_vmem [thread:$0]  (!%p2859_p5), %s3356_s5, 2048, %s2863_s19, [#allocation9], %s2721_s16, %s2721_s16, %s2722_s12  }
  0x52   : > { %s2436_s17 = scalar_lea.hbm %s3325_s9, 2048 }
  0x53   : > { %p2437_p11 = scmp.ne.s32.totalorder %s3325_s9, %s2436_s17  ;;  %p2443_p0 = scmp.lt.u32.totalorder %s2436_s17, %s3325_s9 }
  0x55   : > { %p2439_p12 = pnand %p2437_p11, %p2875_p7 }
  0x57   : > { %p2440_p13 = pneg %p2439_p12 }
  0x59   : > { %p2445_p2 = pnand %p2443_p0, %p2440_p13 }
  0x5b   : > { %2448 = shalt.err (!%p2445_p2)
}
  0x5c   : > { %s2449_s19 = scalar_lea.vmem %s2865_s21, 2048  ;;  %p2457_p9 = scmp.lt.s32.totalorder %s2865_s21, %s2865_s21 }
  0x5d   : > { %p2450_p4 = scmp.ne.s32.totalorder %s2865_s21, %s2449_s19  ;;  %p2458_p10 = scmp.lt.s32.totalorder %s2449_s19, %s2449_s19 }
  0x5f   : > { %p2452_p6 = pnand %p2450_p4, %p2875_p7  ;;  %p2459_p11 = por %p2458_p10, %p2457_p9 }
  0x61   : > { %p2453_p8 = pneg %p2452_p6 }
  0x63   : > { %p2460_p12 = pnand %p2459_p11, %p2453_p8 }
  0x65   : > { %2463 = shalt.err (!%p2460_p12)
}
  0x66   : > { %2295 = dma.hbm_to_vmem [thread:$0]  (!%p2859_p5), %s3325_s9, 2048, %s2865_s21, [#allocation12], %s2721_s16, %s2721_s16, %s2722_s12  }
  0x67   : > { %s2723_s6 = smov [#allocation14]   ;;  %s2724_s10 = smov [#allocation7]  }
  0x68   : > { %s538_s8 = sshll.u32 %s2723_s6, 4  ;;  %s458_s17 = sshll.u32 %s2724_s10, 4  ;;  %s539_s8 = int_to_ptr.vmem [resolvable:$true] %s538_s8  ;;  %s459_s17 = int_to_ptr.vmem [resolvable:$true] %s458_s17 }
  0x69   : > { %s2464_s20 = scalar_lea.hbm %s3329_s13, 2048 }
  0x6a   : > { %p2465_p13 = scmp.ne.s32.totalorder %s3329_s13, %s2464_s20  ;;  %p2471_p4 = scmp.lt.u32.totalorder %s2464_s20, %s3329_s13 }
  0x6c   : > { %p2467_p0 = pnand %p2465_p13, %p2875_p7 }
  0x6e   : > { %p2468_p2 = pneg %p2467_p0 }
  0x70   : > { %p2473_p6 = pnand %p2471_p4, %p2468_p2 }
  0x72   : > { %2476 = shalt.err (!%p2473_p6)
}
  0x73   : > { %s2477_s21 = scalar_lea.vmem %s539_s8, 2048  ;;  %p2485_p11 = scmp.lt.s32.totalorder %s539_s8, %s539_s8 }
  0x74   : > { %p2478_p8 = scmp.ne.s32.totalorder %s539_s8, %s2477_s21  ;;  %p2486_p12 = scmp.lt.s32.totalorder %s2477_s21, %s2477_s21 }
  0x76   : > { %p2480_p9 = pnand %p2478_p8, %p2875_p7  ;;  %p2487_p1 = por %p2486_p12, %p2485_p11 }
  0x78   : > { %p2481_p10 = pneg %p2480_p9 }
  0x7a   : > { %p2488_p3 = pnand %p2487_p1, %p2481_p10 }
  0x7c   : > { %2491 = shalt.err (!%p2488_p3)
}
  0x7d   : > { %2301 = dma.hbm_to_vmem [thread:$0]  (!%p2859_p5), %s3329_s13, 2048, %s539_s8, [#allocation15], %s2721_s16, %s2721_s16, %s2722_s12  }
  0x7e   : > { %s3357_s3 = sld [smem:[#allocation26_spill]] }
  0x84   : > { %s2492_s22 = scalar_lea.hbm %s3357_s3, 2048 }
  0x85   : > { %p2493_p1 = scmp.ne.s32.totalorder %s3357_s3, %s2492_s22  ;;  %p2499_p0 = scmp.lt.u32.totalorder %s2492_s22, %s3357_s3 }
  0x87   : > { %p2495_p3 = pnand %p2493_p1, %p2875_p7 }
  0x89   : > { %p2496_p13 = pneg %p2495_p3 }
  0x8b   : > { %p2501_p2 = pnand %p2499_p0, %p2496_p13 }
  0x8d   : > { %2504 = shalt.err (!%p2501_p2)
}
  0x8e   : > { %s2505_s29 = scalar_lea.vmem %s459_s17, 2048  ;;  %p2513_p9 = scmp.lt.s32.totalorder %s459_s17, %s459_s17 }
  0x8f   : > { %p2506_p4 = scmp.ne.s32.totalorder %s459_s17, %s2505_s29  ;;  %p2514_p10 = scmp.lt.s32.totalorder %s2505_s29, %s2505_s29 }
  0x91   : > { %p2508_p6 = pnand %p2506_p4, %p2875_p7  ;;  %p2515_p11 = por %p2514_p10, %p2513_p9 }
  0x93   : > { %p2509_p8 = pneg %p2508_p6 }
  0x95   : > { %p2516_p12 = pnand %p2515_p11, %p2509_p8 }
  0x97   : > { %2519 = shalt.err (!%p2516_p12)
}
  0x98   : > { %2286 = dma.hbm_to_vmem [thread:$0]  (!%p2859_p5), %s3357_s3, 2048, %s459_s17, [#allocation6], %s2721_s16, %s2721_s16, %s2722_s12  }
  0x99   : > { %s2725_s5 = smov [#allocation10]   ;;  %s2726_s6 = smov [#allocation13]  }
  0x9a   : > { %s490_s4 = sshll.u32 %s2725_s5, 4  ;;  %s522_s10 = sshll.u32 %s2726_s6, 4  ;;  %s491_s4 = int_to_ptr.vmem [resolvable:$true] %s490_s4  ;;  %s523_s10 = int_to_ptr.vmem [resolvable:$true] %s522_s10 }
  0x9b   : > { %s2520_s20 = scalar_lea.hbm %s3323_s7, 2048 }
  0x9c   : > { %p2521_p1 = scmp.ne.s32.totalorder %s3323_s7, %s2520_s20  ;;  %p2527_p0 = scmp.lt.u32.totalorder %s2520_s20, %s3323_s7 }
  0x9e   : > { %p2523_p3 = pnand %p2521_p1, %p2875_p7 }
  0xa0   : > { %p2524_p13 = pneg %p2523_p3 }
  0xa2   : > { %p2529_p2 = pnand %p2527_p0, %p2524_p13 }
  0xa4   : > { %2532 = shalt.err (!%p2529_p2)
}
  0xa5   : > { %s2533_s17 = scalar_lea.vmem %s491_s4, 2048  ;;  %p2541_p9 = scmp.lt.s32.totalorder %s491_s4, %s491_s4 }
  0xa6   : > { %p2534_p4 = scmp.ne.s32.totalorder %s491_s4, %s2533_s17  ;;  %p2542_p10 = scmp.lt.s32.totalorder %s2533_s17, %s2533_s17 }
  0xa8   : > { %p2536_p6 = pnand %p2534_p4, %p2875_p7  ;;  %p2543_p11 = por %p2542_p10, %p2541_p9 }
  0xaa   : > { %p2537_p8 = pneg %p2536_p6 }
  0xac   : > { %p2544_p12 = pnand %p2543_p11, %p2537_p8 }
  0xae   : > { %2547 = shalt.err (!%p2544_p12)
}
  0xaf   : > { %2292 = dma.hbm_to_vmem [thread:$0]  (!%p2859_p5), %s3323_s7, 2048, %s491_s4, [#allocation9], %s2721_s16, %s2721_s16, %s2722_s12  }
  0xb0   : > { %s2548_s23 = scalar_lea.hbm %s3327_s11, 2048 }
  0xb1   : > { %p2549_p1 = scmp.ne.s32.totalorder %s3327_s11, %s2548_s23  ;;  %p2555_p0 = scmp.lt.u32.totalorder %s2548_s23, %s3327_s11 }
  0xb3   : > { %p2551_p3 = pnand %p2549_p1, %p2875_p7 }
  0xb5   : > { %p2552_p13 = pneg %p2551_p3 }
  0xb7   : > { %p2557_p2 = pnand %p2555_p0, %p2552_p13 }
  0xb9   : > { %2560 = shalt.err (!%p2557_p2)
}
  0xba   : > { %s2561_s8 = scalar_lea.vmem %s523_s10, 2048  ;;  %p2569_p9 = scmp.lt.s32.totalorder %s523_s10, %s523_s10 }
  0xbb   : > { %p2562_p4 = scmp.ne.s32.totalorder %s523_s10, %s2561_s8  ;;  %p2570_p10 = scmp.lt.s32.totalorder %s2561_s8, %s2561_s8 }
  0xbd   : > { %p2564_p6 = pnand %p2562_p4, %p2875_p7  ;;  %p2571_p11 = por %p2570_p10, %p2569_p9 }
  0xbf   : > { %p2565_p8 = pneg %p2564_p6 }
  0xc1   : > { %p2572_p12 = pnand %p2571_p11, %p2565_p8 }
  0xc3   : > { %2575 = shalt.err (!%p2572_p12)
}
  0xc4   : > { %2298 = dma.hbm_to_vmem [thread:$0]  (!%p2859_p5), %s3327_s11, 2048, %s523_s10, [#allocation12], %s2721_s16, %s2721_s16, %s2722_s12  }
  0xc5   : > { %s2727_s21 = smov [#allocation16]   ;;  %s2576_s23 = scalar_lea.hbm %s3331_s15, 2048 }
  0xc6   : > { %s554_s5 = sshll.u32 %s2727_s21, 4  ;;  %p2577_p1 = scmp.ne.s32.totalorder %s3331_s15, %s2576_s23  ;;  %s555_s5 = int_to_ptr.vmem [resolvable:$true] %s554_s5 }
  0xc7   : > { %p2583_p0 = scmp.lt.u32.totalorder %s2576_s23, %s3331_s15 }
  0xc8   : > { %p2579_p3 = pnand %p2577_p1, %p2875_p7 }
  0xca   : > { %p2580_p13 = pneg %p2579_p3 }
  0xcc   : > { %p2585_p2 = pnand %p2583_p0, %p2580_p13 }
  0xce   : > { %2588 = shalt.err (!%p2585_p2)
}
  0xcf   : > { %s2589_s10 = scalar_lea.vmem %s555_s5, 2048  ;;  %p2597_p9 = scmp.lt.s32.totalorder %s555_s5, %s555_s5 }
  0xd0   : > { %p2590_p4 = scmp.ne.s32.totalorder %s555_s5, %s2589_s10  ;;  %p2598_p10 = scmp.lt.s32.totalorder %s2589_s10, %s2589_s10 }
  0xd2   : > { %p2592_p6 = pnand %p2590_p4, %p2875_p7  ;;  %p2599_p11 = por %p2598_p10, %p2597_p9 }
  0xd4   : > { %p2593_p8 = pneg %p2592_p6 }
  0xd6   : > { %p2600_p12 = pnand %p2599_p11, %p2593_p8 }
  0xd8   : > { %2603 = shalt.err (!%p2600_p12)
}
  0xd9   : > { %2304 = dma.hbm_to_vmem [thread:$0]  (!%p2859_p5), %s3331_s15, 2048, %s555_s5, [#allocation15], %s2721_s16, %s2721_s16, %s2722_s12  }
  0xda   : > { %s1599_s1 = sadd.s32 4294967294, %s2716_s27   ;;  %s3058_s18 = sadd.s32 1, %s2716_s27  }
  0xdb   : > { %s41_s17 = ssub.s32 %s2716_s27, %s3058_s18  ;;  %s44_s21 = sadd.s32 1, %s2712_s26 }
  0xdc   : > { %p42_p7 = scmp.eq.s32.totalorder %s41_s17, 0  ;;  %p51_p1 = scmp.ne.s32.totalorder %s2712_s26, %s2708_s25 }
  0xdd   : > { %p52_p3 = scmp.eq.s32.totalorder %s2716_s27, 0  ;;  %p57_p13 = scmp.ne.s32.totalorder %s2708_s25, %s2704_s24 }
  0xde   : > { %s3069_s6 = scalar_select %p42_p7, %s2712_s26, %s44_s21  }
  0xdf   : > { %p3071_p0 = por %p52_p3, %p51_p1  ;;  %p3359_p2 = scmp.eq.s32.totalorder %s2844_s0, 0 }
  0xe0   : > { %p417_p4 = scmp.eq.s32.totalorder %s2844_s0, 7  ;;  %p423_p6 = scmp.eq.s32.totalorder %s1599_s1, 7 }
  0xe1   : > { %p3077_p5 = por %p3359_p2, %p57_p13  ;;  %p2321_p8 = scmp.lt.s32.totalorder %s2716_s27, 8 }
  0xe2   : > { %s571_s12 = sand.u32 1, %s2712_s26   ;;  %p3084_p9 = por %p417_p4, %p51_p1 }
  0xe3   : > { %p3088_p10 = por %p423_p6, %p57_p13  ;;  %s1610_s20 = sshll.u32 %s571_s12, 3 }
  0xe4   : > { %s3361_s5 = scalar_select %p3084_p9, 1, 0 }
  0xe5   : > { %s3362_s23 = scalar_select %p3088_p10, 1, 0 }
  0xe6   : > { %s1611_s14 = sshll.u32 %s2716_s27, 7  ;;  %s3363_s10 = sld [smem:[#allocation24_spill]] }
  0xe7   : > { %s575_s4 = scalar_lea.vmem [#allocation2], %s1610_s20  ;;  %p3102_p11 = pnand %p2321_p8, %p3071_p0 }
  0xe8   : > { %s582_s1 = sshll.u32 %s575_s4, 4  ;;  %s572_s21 = scalar_lea.sflag [#allocation3], %s571_s12  ;;  %s3098_s1 = int_to_ptr.vmem [resolvable:$true] %s582_s1 }
  0xe9   : > { %p2606_p7 = pneg %p3102_p11 }
  0xec   : > { %s3096_s8 = scalar_lea.hbm %s3363_s10, %s1611_s14  ;;  %s2609_s19 = scalar_lea.hbm %s3363_s10, 1024 }
  0xed   : > { %s2604_s3 = scalar_lea.hbm %s3096_s8, 128  ;;  %p2610_p13 = scmp.lt.u32.totalorder %s3096_s8, %s3363_s10 }
  0xee   : > { %p2605_p12 = scmp.ne.s32.totalorder %s3096_s8, %s2604_s3  ;;  %p2611_p0 = scmp.lt.u32.totalorder %s2609_s19, %s2604_s3 }
  0xef   : > { %p2613_p4 = scmp.lt.u32.totalorder %s2604_s3, %s3096_s8 }
  0xf0   : > { %p2607_p1 = pnand %p2606_p7, %p2605_p12  ;;  %p2612_p2 = por %p2611_p0, %p2610_p13 }
  0xf2   : > { %p2608_p3 = pneg %p2607_p1  ;;  %p2614_p6 = por %p2613_p4, %p2612_p2 }
  0xf4   : > { %p2615_p8 = pnand %p2614_p6, %p2608_p3 }
  0xf6   : > { %2618 = shalt.err (!%p2615_p8)
}
  0xf7   : > { %s2619_s12 = scalar_lea.vmem %s3098_s1, 128  ;;  %s2728_s4 = smov [#allocation2]  }
  0xf8   : > { %p2620_p12 = scmp.ne.s32.totalorder %s3098_s1, %s2619_s12  ;;  %s2624_s20 = sshll.u32 %s2728_s4, 4  ;;  %s2625_s20 = int_to_ptr.vmem [resolvable:$false] %s2624_s20 }
  0xf9   : > { %s2626_s14 = scalar_lea.vmem %s2625_s20, 256  ;;  %p2627_p9 = scmp.lt.s32.totalorder %s3098_s1, %s2625_s20 }
  0xfa   : > { %p2622_p1 = pnand %p2620_p12, %p2606_p7  ;;  %p2628_p13 = scmp.lt.s32.totalorder %s2626_s14, %s2619_s12 }
  0xfc   : > { %p2623_p10 = pneg %p2622_p1  ;;  %p2629_p0 = por %p2628_p13, %p2627_p9 }
  0xfe   : > { %p2630_p2 = pnand %p2629_p0, %p2623_p10 }
 0x100   : > { %2633 = shalt.err (!%p2630_p2)
}
 0x101   : > { %2308 = dma.hbm_to_vmem [thread:$0]  (!%p3102_p11), %s3096_s8, 128, %s3098_s1, %s572_s21  }
 0x102   : > { %p3365_p3 = scmp.ne.s32.totalorder %s3352_s30, 0 }
 0x103   : > { %s3134_s3 = sand.u32 (!%p3365_p3), 1, %s2708_s25  }
 0x104   : > { %591 = sbr.rel (%p3365_p3) target bundleno = 2081 (0x821), region = 88  ;;  %s1613_s19 = sshll.u32 (!%p3365_p3), %s3134_s3, 3 }
 0x105   : > { %s594_s22 = scalar_lea.sflag (!%p3365_p3), [#allocation3], %s3134_s3  ;;  %s3140_s29 = scalar_lea.vmem (!%p3365_p3), [#allocation2], %s1613_s19 }
 0x10b   : > { %2679 = dma.done.wait (%p3077_p5), %s594_s22, 128  }
 0x10c   : > { %2681 = vsyncadd (%p3077_p5), %s594_s22, 4294967168  ;;  %p3366_p9 = scmp.eq.s32.totalorder %s2844_s0, 0 }
 0x10e   : > { %2683 = dma.done.wait (%p3366_p9), [#allocation6], 4096   ;;  %p3367_p10 = pmov %p3366_p9 }
 0x10f   : > { %p3368_p11 = pmov %p3366_p9 }
 0x110   : > { %2685 = vsyncadd (%p3367_p10), [#allocation6], 4294963200 }
 0x111   : > { %2687 = dma.done.wait (%p3368_p11), [#allocation9], 4096   ;;  %p3369_p7 = pmov %p3366_p9 }
 0x113   : > { %2689 = vsyncadd (%p3369_p7), [#allocation9], 4294963200  ;;  %p3370_p4 = pmov %p3369_p7 }
 0x115   : > { %2691 = dma.done.wait (%p3370_p4), [#allocation12], 4096   ;;  %p3371_p6 = pmov %p3370_p4 }
 0x116   : > { %p3372_p5 = pmov %p3370_p4 }
 0x117   : > { %2693 = vsyncadd (%p3371_p6), [#allocation12], 4294963200 }
 0x118   : > { %2695 = dma.done.wait (%p3372_p5), [#allocation15], 4096   ;;  %p3373_p8 = pmov %p3370_p4 }
 0x119   : > { %v2729_v0 = vmov 0.0|0.0   ;;  %vm2730_vm0 = vmmov 0   ;;  %v2731_v1 = vmov 0.0   ;;  %v681_v2 = vld [vmem:[#allocation5] sm:$0xff]  ;;  %v682_v3 = vld [vmem:[#allocation5 + $0x8] sm:$0xff]  ;;  %v683_v4 = vld [vmem:[#allocation5 + $0x10] sm:$0xff] }
 0x11a   : > { %2697 = vsyncadd (%p3373_p8), [#allocation15], 4294963200  ;;  %2052 = vmatprep.subr.bf16.mxu0 %v2729_v0  ;;  %1804 = vmatprep.mubr.msk.f32.mxu0 %vm2730_vm0, %v2731_v1  ;;  %v2053_v5 = vpack.c.bf16 %v682_v3, %v681_v2  ;;  %v684_v6 = vld [vmem:[#allocation5 + $0x18] sm:$0xff]  ;;  %v685_v8 = vld [vmem:[#allocation5 + $0x20] sm:$0xff]  ;;  %s3374_s17 = sld [smem:[#allocation27_spill]]  ;;  %s3375_s4 = sld [smem:[#allocation29_spill]] }
 0x11b   : > { %2076 = vmatprep.subr.bf16.mxu1 %v2729_v0  ;;  %1839 = vmatprep.mubr.msk.f32.mxu1 %vm2730_vm0, %v2731_v1  ;;  %v2056_v7 = vpack.c.bf16 %v684_v6, %v683_v4  ;;  %v686_v9 = vld [vmem:[#allocation5 + $0x28] sm:$0xff]  ;;  %v775_v10 = vld [vmem:[#allocation7] sm:$0xff]  ;;  %v777_v12 = vld [vmem:[#allocation7 + $0x10] sm:$0xff]  ;;  %s3376_s22 = sld [smem:[#allocation30_spill]]  ;;  %s3377_s16 = sld [smem:[#allocation31_spill]] }
 0x11c   : > { %2054 = vmatpush3.bf16.msra.mxu0 %v2053_v5  ;;  %v776_v11 = vld [vmem:[#allocation7 + $0x8] sm:$0xff]  ;;  %v778_v13 = vld [vmem:[#allocation7 + $0x18] sm:$0xff]  ;;  %v2059_v14 = vpack.c.bf16 %v686_v9, %v685_v8  ;;  %v687_v16 = vld [vmem:[#allocation5 + $0x30] sm:$0xff]  ;;  %s679_s30 = scalar_lea.vmem [#allocation17], %s1613_s19  ;;  %s1440_s12 = scalar_lea.sflag [#allocation4], %s3134_s3 }
 0x11d   : > { %2055 = vmatprep.subr.bf16.mxu0 %v2729_v0  ;;  %v2077_v15 = vpack.c.bf16 %v776_v11, %v775_v10  ;;  %v688_v17 = vld [vmem:[#allocation5 + $0x38] sm:$0xff]  ;;  %v2080_v18 = vpack.c.bf16 %v778_v13, %v777_v12  ;;  %v779_v19 = vld [vmem:[#allocation7 + $0x20] sm:$0xff]  ;;  %v780_v20 = vld [vmem:[#allocation7 + $0x28] sm:$0xff]  ;;  %p3382_p1 = scmp.ne.s32.totalorder %s3361_s5, 0 }
 0x11e   : > { %v2062_v21 = vpack.c.bf16 %v688_v17, %v687_v16  ;;  %v689_v22 = vld [vmem:[#allocation5 + $0x40] sm:$0xff]  ;;  %v690_v23 = vld [vmem:[#allocation5 + $0x48] sm:$0xff]  ;;  %v2083_v24 = vpack.c.bf16 %v780_v20, %v779_v19  ;;  %v781_v25 = vld [vmem:[#allocation7 + $0x30] sm:$0xff] }
 0x11f   : > { %2078 = vmatpush3.bf16.msra.mxu1 %v2077_v15  ;;  %v782_v26 = vld [vmem:[#allocation7 + $0x38] sm:$0xff]  ;;  %v2065_v27 = vpack.c.bf16 %v690_v23, %v689_v22  ;;  %v691_v28 = vld [vmem:[#allocation5 + $0x50] sm:$0xff]  ;;  %v783_v31 = vld [vmem:[#allocation7 + $0x40] sm:$0xff] }
 0x120   : > { %2057 = vmatpush3.bf16.msra.mxu0 %v2056_v7  ;;  %2079 = vmatprep.subr.bf16.mxu1 %v2729_v0  ;;  %v692_v29 = vld [vmem:[#allocation5 + $0x58] sm:$0xff]  ;;  %v2086_v30 = vpack.c.bf16 %v782_v26, %v781_v25  ;;  %v784_v32 = vld [vmem:[#allocation7 + $0x48] sm:$0xff]  ;;  %v693_v34 = vld [vmem:[#allocation5 + $0x60] sm:$0xff] }
 0x121   : > { %2058 = vmatprep.subr.bf16.mxu0 %v2729_v0  ;;  %v2068_v33 = vpack.c.bf16 %v692_v29, %v691_v28  ;;  %v694_v35 = vld [vmem:[#allocation5 + $0x68] sm:$0xff]  ;;  %v2089_v36 = vpack.c.bf16 %v784_v32, %v783_v31  ;;  %v785_v37 = vld [vmem:[#allocation7 + $0x50] sm:$0xff]  ;;  %v786_v38 = vld [vmem:[#allocation7 + $0x58] sm:$0xff] }
 0x122   : > { %v2071_v39 = vpack.c.bf16 %v694_v35, %v693_v34  ;;  %v695_v40 = vld [vmem:[#allocation5 + $0x70] sm:$0xff]  ;;  %v696_v41 = vld [vmem:[#allocation5 + $0x78] sm:$0xff]  ;;  %v2092_v42 = vpack.c.bf16 %v786_v38, %v785_v37  ;;  %v787_v43 = vld [vmem:[#allocation7 + $0x60] sm:$0xff] }
 0x123   : > { %2081 = vmatpush3.bf16.msra.mxu1 %v2080_v18  ;;  %v788_v44 = vld [vmem:[#allocation7 + $0x68] sm:$0xff]  ;;  %v2074_v45 = vpack.c.bf16 %v696_v41, %v695_v40  ;;  %v680_v47 = vld [vmem:[%s3140_s29] sm:$0xff]  ;;  %v869_v51 = vld [vmem:[#allocation8] sm:$0xff]  ;;  %s1633_s29 = sshll.u32 %s2844_s0, 7  ;;  %s2732_s0 = smov [#allocation17]  }
 0x124   : > { %2060 = vmatpush3.bf16.msra.mxu0 %v2059_v14  ;;  %2082 = vmatprep.subr.bf16.mxu1 %v2729_v0  ;;  %v2095_v46 = vpack.c.bf16 %v788_v44, %v787_v43  ;;  %v789_v48 = vld [vmem:[#allocation7 + $0x70] sm:$0xff]  ;;  %v790_v49 = vld [vmem:[#allocation7 + $0x78] sm:$0xff]  ;;  %v870_v52 = vld [vmem:[#allocation8 + $0x8] sm:$0xff]  ;;  %s2638_s19 = sshll.u32 %s2732_s0, 4  ;;  %s2639_s19 = int_to_ptr.vmem [resolvable:$false] %s2638_s19 }
 0x125   : > { %2061 = vmatprep.subr.bf16.mxu0 %v2729_v0  ;;  %v2098_v50 = vpack.c.bf16 %v790_v49, %v789_v48  ;;  %v871_v53 = vld [vmem:[#allocation8 + $0x10] sm:$0xff]  ;;  %v2101_v54 = vpack.c.bf16 %v870_v52, %v869_v51  ;;  %v872_v55 = vld [vmem:[#allocation8 + $0x18] sm:$0xff]  ;;  %v873_v57 = vld [vmem:[#allocation8 + $0x20] sm:$0xff]  ;;  %s2640_s20 = scalar_lea.vmem %s2639_s19, 256 }
 0x126   : > { %v2104_v56 = vpack.c.bf16 %v872_v55, %v871_v53  ;;  %v874_v58 = vld [vmem:[#allocation8 + $0x28] sm:$0xff]  ;;  %v875_v60 = vld [vmem:[#allocation8 + $0x30] sm:$0xff]  ;;  %v876_v61 = vld [vmem:[#allocation8 + $0x38] sm:$0xff] }
 0x127   : > { %2084 = vmatpush3.bf16.msra.mxu1 %v2083_v24  ;;  %v2107_v59 = vpack.c.bf16 %v874_v58, %v873_v57  ;;  %v2110_v62 = vpack.c.bf16 %v876_v61, %v875_v60  ;;  %v877_v63 = vld [vmem:[#allocation8 + $0x40] sm:$0xff]  ;;  %v878_v2 = vld [vmem:[#allocation8 + $0x48] sm:$0xff]  ;;  %v879_v4 = vld [vmem:[#allocation8 + $0x50] sm:$0xff] }
 0x128   : > { %2063 = vmatpush3.bf16.msra.mxu0 %v2062_v21  ;;  %2085 = vmatprep.subr.bf16.mxu1 %v2729_v0  ;;  %v2113_v3 = vpack.c.bf16 %v878_v2, %v877_v63  ;;  %v880_v5 = vld [vmem:[#allocation8 + $0x58] sm:$0xff]  ;;  %v881_v7 = vld [vmem:[#allocation8 + $0x60] sm:$0xff]  ;;  %v882_v8 = vld [vmem:[#allocation8 + $0x68] sm:$0xff] }
 0x129   : > { %2064 = vmatprep.subr.bf16.mxu0 %v2729_v0  ;;  %v2116_v6 = vpack.c.bf16 %v880_v5, %v879_v4  ;;  %v2119_v9 = vpack.c.bf16 %v882_v8, %v881_v7  ;;  %v1623_v10 = vld [vmem:[%s3318_s2] ss:$0 sm:$0xff]  ;;  %v884_v16 = vld [vmem:[#allocation8 + $0x78] sm:$0xff]  ;;  %v963_v18 = vld [vmem:[#allocation10] sm:$0xff] }
 0x12a   : > { %v883_v15 = vld [vmem:[#allocation8 + $0x70] sm:$0xff]  ;;  %v964_v19 = vld [vmem:[#allocation10 + $0x8] sm:$0xff]  ;;  %v966_v22 = vld [vmem:[#allocation10 + $0x18] sm:$0xff] }
 0x12b   : > { %2087 = vmatpush3.bf16.msra.mxu1 %v2086_v30  ;;  %v2122_v17 = vpack.c.bf16 %v884_v16, %v883_v15  ;;  %v965_v20 = vld [vmem:[#allocation10 + $0x10] sm:$0xff]  ;;  %v2125_v21 = vpack.c.bf16 %v964_v19, %v963_v18  ;;  %v967_v24 = vld [vmem:[#allocation10 + $0x20] sm:$0xff]  ;;  %v968_v25 = vld [vmem:[#allocation10 + $0x28] sm:$0xff] }
 0x12c   : > { %2066 = vmatpush3.bf16.msra.mxu0 %v2065_v27  ;;  %2088 = vmatprep.subr.bf16.mxu1 %v2729_v0  ;;  %v2128_v23 = vpack.c.bf16 %v966_v22, %v965_v20  ;;  %v2131_v26 = vpack.c.bf16 %v968_v25, %v967_v24  ;;  %v969_v27 = vld [vmem:[#allocation10 + $0x30] sm:$0xff]  ;;  %v970_v28 = vld [vmem:[#allocation10 + $0x38] sm:$0xff]  ;;  %v971_v30 = vld [vmem:[#allocation10 + $0x40] sm:$0xff] }
 0x12d   : > { %2067 = vmatprep.subr.bf16.mxu0 %v2729_v0  ;;  %v2134_v29 = vpack.c.bf16 %v970_v28, %v969_v27  ;;  %v972_v31 = vld [vmem:[#allocation10 + $0x48] sm:$0xff]  ;;  %v974_v34 = vld [vmem:[#allocation10 + $0x58] sm:$0xff]  ;;  %v977_v44 = vld [vmem:[#allocation10 + $0x70] sm:$0xff] }
 0x12e   : > { %v2137_v32 = vpack.c.bf16 %v972_v31, %v971_v30  ;;  %v976_v37 = vld [vmem:[#allocation10 + $0x68] sm:$0xff]  ;;  %v1059_v49 = vld [vmem:[#allocation11 + $0x10] sm:$0xff]  ;;  %v1060_v51 = vld [vmem:[#allocation11 + $0x18] sm:$0xff] }
 0x12f   : > { %2090 = vmatpush3.bf16.msra.mxu1 %v2089_v36  ;;  %v975_v36 = vld [vmem:[#allocation10 + $0x60] sm:$0xff]  ;;  %v1058_v48 = vld [vmem:[#allocation11 + $0x8] sm:$0xff]  ;;  %v2152_v52 = vpack.c.bf16 %v1060_v51, %v1059_v49  ;;  %v1064_v57 = vld [vmem:[#allocation11 + $0x38] sm:$0xff] }
 0x130   : > { %2069 = vmatpush3.bf16.msra.mxu0 %v2068_v33  ;;  %2091 = vmatprep.subr.bf16.mxu1 %v2729_v0  ;;  %v973_v33 = vld [vmem:[#allocation10 + $0x50] sm:$0xff]  ;;  %v2143_v38 = vpack.c.bf16 %v976_v37, %v975_v36  ;;  %v1061_v53 = vld [vmem:[#allocation11 + $0x20] sm:$0xff]  ;;  %v1066_v60 = vld [vmem:[#allocation11 + $0x48] sm:$0xff] }
 0x131   : > { %2070 = vmatprep.subr.bf16.mxu0 %v2729_v0  ;;  %v2140_v35 = vpack.c.bf16 %v974_v34, %v973_v33  ;;  %v1068_v63 = vld [vmem:[#allocation11 + $0x58] sm:$0xff]  ;;  %v1070_v4 = vld [vmem:[#allocation11 + $0x68] sm:$0xff]  ;;  %v1153_v16 = vld [vmem:[#allocation13 + $0x10] sm:$0xff] }
 0x132   : > { %v1152_v15 = vld [vmem:[#allocation13 + $0x8] sm:$0xff]  ;;  %v1154_v18 = vld [vmem:[#allocation13 + $0x18] sm:$0xff]  ;;  %v1155_v20 = vld [vmem:[#allocation13 + $0x20] sm:$0xff] }
 0x133   : > { %2093 = vmatpush3.bf16.msra.mxu1 %v2092_v42  ;;  %v2176_v19 = vpack.c.bf16 %v1154_v18, %v1153_v16  ;;  %v1158_v24 = vld [vmem:[#allocation13 + $0x38] sm:$0xff]  ;;  %v1160_v27 = vld [vmem:[#allocation13 + $0x48] sm:$0xff]  ;;  %v1249_v49 = vld [vmem:[#allocation14 + $0x20] sm:$0xff] }
 0x134   : > { %2072 = vmatpush3.bf16.msra.mxu0 %v2071_v39  ;;  %2094 = vmatprep.subr.bf16.mxu1 %v2729_v0  ;;  %v1624_v39 = vld [vmem:[%s3374_s17] ss:$0 sm:$0xff]  ;;  %v1162_v30 = vld [vmem:[#allocation13 + $0x58] sm:$0xff]  ;;  %v1164_v33 = vld [vmem:[#allocation13 + $0x68] sm:$0xff]  ;;  %s3378_s17 = sld [smem:[#allocation32_spill]] }
 0x135   : > { %2073 = vmatprep.subr.bf16.mxu0 %v2729_v0  ;;  %v1343_v16 = vld [vmem:[#allocation16 + $0x20] sm:$0xff] }
 0x137   : > { %2096 = vmatpush3.bf16.msra.mxu1 %v2095_v46 }
 0x138   : > { %2075 = vmatpush3.bf16.msra.mxu0 %v2074_v45  ;;  %2097 = vmatprep.subr.bf16.mxu1 %v2729_v0  ;;  %v978_v45 = vld [vmem:[#allocation10 + $0x78] sm:$0xff] }
 0x139   : > { %2100 = vmatprep.subr.bf16.mxu0 %v2729_v0  ;;  %v2146_v46 = vpack.c.bf16 %v978_v45, %v977_v44  ;;  %v1246_v44 = vld [vmem:[#allocation14 + $0x8] sm:$0xff]  ;;  %v1247_v45 = vld [vmem:[#allocation14 + $0x10] sm:$0xff] }
 0x13b   : > { %1805 = vmatmul.mubr.f32.vlgmr.msra.gmra.mrb[0].mxu0 %v680_v47  ;;  %2099 = vmatpush3.bf16.msra.mxu1 %v2098_v50  ;;  %v1057_v47 = vld [vmem:[#allocation11] sm:$0xff] }
 0x13c   : > { %1874 = vmatprep.mubr.msk.f32.mxu0 %vm2730_vm0, %v2731_v1  ;;  %2124 = vmatprep.subr.bf16.mxu1 %v2729_v0  ;;  %v2149_v50 = vpack.c.bf16 %v1058_v48, %v1057_v47  ;;  %v1248_v47 = vld [vmem:[#allocation14 + $0x18] sm:$0xff] }
 0x13d   : > { %2102 = vmatpush3.bf16.msra.mxu0 %v2101_v54  ;;  %v1062_v54 = vld [vmem:[#allocation11 + $0x28] sm:$0xff]  ;;  %v2200_v48 = vpack.c.bf16 %v1248_v47, %v1247_v45 }
 0x13e   : > { %2103 = vmatprep.subr.bf16.mxu0 %v2729_v0  ;;  %v2155_v55 = vpack.c.bf16 %v1062_v54, %v1061_v53  ;;  %v1252_v53 = vld [vmem:[#allocation14 + $0x38] sm:$0xff] }
 0x141   : > { %2105 = vmatpush3.bf16.msra.mxu0 %v2104_v56  ;;  %v1063_v56 = vld [vmem:[#allocation11 + $0x30] sm:$0xff] }
 0x142   : > { %2106 = vmatprep.subr.bf16.mxu0 %v2729_v0  ;;  %v2158_v58 = vpack.c.bf16 %v1064_v57, %v1063_v56  ;;  %v1254_v56 = vld [vmem:[#allocation14 + $0x48] sm:$0xff] }
 0x145   : > { %2108 = vmatpush3.bf16.msra.mxu0 %v2107_v59  ;;  %v1065_v59 = vld [vmem:[#allocation11 + $0x40] sm:$0xff] }
 0x146   : > { %2109 = vmatprep.subr.bf16.mxu0 %v2729_v0  ;;  %v2161_v61 = vpack.c.bf16 %v1066_v60, %v1065_v59  ;;  %v1256_v59 = vld [vmem:[#allocation14 + $0x58] sm:$0xff] }
 0x149   : > { %2111 = vmatpush3.bf16.msra.mxu0 %v2110_v62  ;;  %v1067_v62 = vld [vmem:[#allocation11 + $0x50] sm:$0xff] }
 0x14a   : > { %2112 = vmatprep.subr.bf16.mxu0 %v2729_v0  ;;  %v2164_v2 = vpack.c.bf16 %v1068_v63, %v1067_v62  ;;  %v1258_v62 = vld [vmem:[#allocation14 + $0x68] sm:$0xff] }
 0x14d   : > { %2114 = vmatpush3.bf16.msra.mxu0 %v2113_v3  ;;  %v1069_v3 = vld [vmem:[#allocation11 + $0x60] sm:$0xff] }
 0x14e   : > { %2115 = vmatprep.subr.bf16.mxu0 %v2729_v0  ;;  %v2167_v5 = vpack.c.bf16 %v1070_v4, %v1069_v3 }
 0x151   : > { %2117 = vmatpush3.bf16.msra.mxu0 %v2116_v6  ;;  %v1625_v6 = vld [vmem:[%s3375_s4] ss:$0 sm:$0xff]  ;;  %s3379_s4 = sld [smem:[#allocation33_spill]] }
 0x152   : > { %2118 = vmatprep.subr.bf16.mxu0 %v2729_v0 }
 0x155   : > { %2120 = vmatpush3.bf16.msra.mxu0 %v2119_v9 }
 0x156   : > { %2121 = vmatprep.subr.bf16.mxu0 %v2729_v0 }
 0x159   : > { %2123 = vmatpush3.bf16.msra.mxu0 %v2122_v17 }
 0x15a   : > { %2148 = vmatprep.subr.bf16.mxu0 %v2729_v0 }
 0x20e   : > { %v770_v11 = vpop.f32.mrb[0].mxu0 }
 0x20f   : > { %v771_v12 = vadd.f32 %v1623_v10, %v770_v11  ;;  %v1806_v13 = vpop.f32.mrb[1].mxu0  ;;  %v1071_v11 = vld [vmem:[#allocation11 + $0x70] sm:$0xff] }
 0x211   : > { %v774_v14 = vmax.f32 %v771_v12, 0.0  ;;  %v1072_v12 = vld [vmem:[#allocation11 + $0x78] sm:$0xff] }
 0x212   : > { %v2170_v13 = vpack.c.bf16 %v1072_v12, %v1071_v11  ;;  %v1340_v11 = vld [vmem:[#allocation16 + $0x8] sm:$0xff]  ;;  %v1341_v12 = vld [vmem:[#allocation16 + $0x10] sm:$0xff] }
 0x213   : > { %1840 = vmatmul.mubr.f32.vlgmr.msra.gmra.mrb[0].mxu1 %v774_v14  ;;  %v1151_v14 = vld [vmem:[#allocation13] sm:$0xff] }
 0x214   : > { %1909 = vmatprep.mubr.msk.f32.mxu1 %vm2730_vm0, %v2731_v1  ;;  %2126 = vmatpush3.bf16.msra.mxu1 %v2125_v21  ;;  %v2173_v17 = vpack.c.bf16 %v1152_v15, %v1151_v14  ;;  %v1156_v21 = vld [vmem:[#allocation13 + $0x28] sm:$0xff]  ;;  %v1342_v14 = vld [vmem:[#allocation16 + $0x18] sm:$0xff] }
 0x215   : > { %2127 = vmatprep.subr.bf16.mxu1 %v2729_v0  ;;  %v2179_v22 = vpack.c.bf16 %v1156_v21, %v1155_v20  ;;  %v2224_v15 = vpack.c.bf16 %v1342_v14, %v1341_v12  ;;  %v1347_v21 = vld [vmem:[#allocation16 + $0x40] sm:$0xff] }
 0x218   : > { %2129 = vmatpush3.bf16.msra.mxu1 %v2128_v23  ;;  %v1157_v23 = vld [vmem:[#allocation13 + $0x30] sm:$0xff] }
 0x219   : > { %2130 = vmatprep.subr.bf16.mxu1 %v2729_v0  ;;  %v2182_v25 = vpack.c.bf16 %v1158_v24, %v1157_v23  ;;  %v1349_v24 = vld [vmem:[#allocation16 + $0x50] sm:$0xff] }
 0x21c   : > { %2132 = vmatpush3.bf16.msra.mxu1 %v2131_v26  ;;  %v1159_v26 = vld [vmem:[#allocation13 + $0x40] sm:$0xff] }
 0x21d   : > { %2133 = vmatprep.subr.bf16.mxu1 %v2729_v0  ;;  %v2185_v28 = vpack.c.bf16 %v1160_v27, %v1159_v26  ;;  %v1351_v27 = vld [vmem:[#allocation16 + $0x60] sm:$0xff] }
 0x220   : > { %2135 = vmatpush3.bf16.msra.mxu1 %v2134_v29  ;;  %v1161_v29 = vld [vmem:[#allocation13 + $0x50] sm:$0xff] }
 0x221   : > { %2136 = vmatprep.subr.bf16.mxu1 %v2729_v0  ;;  %v2188_v31 = vpack.c.bf16 %v1162_v30, %v1161_v29  ;;  %v1628_v30 = vld [vmem:[%s3378_s17] ss:$0 sm:$0xff]  ;;  %s3381_s17 = sld [smem:[#allocation35_spill]] }
 0x224   : > { %2138 = vmatpush3.bf16.msra.mxu1 %v2137_v32  ;;  %v1163_v32 = vld [vmem:[#allocation13 + $0x60] sm:$0xff] }
 0x225   : > { %2139 = vmatprep.subr.bf16.mxu1 %v2729_v0  ;;  %v2191_v34 = vpack.c.bf16 %v1164_v33, %v1163_v32 }
 0x227   : > { %s3273_s21 = scalar_lea.hbm %s3381_s17, %s1633_s29 }
 0x228   : > { %2141 = vmatpush3.bf16.msra.mxu1 %v2140_v35  ;;  %v1626_v35 = vld [vmem:[%s3376_s22] ss:$0 sm:$0xff]  ;;  %s3380_s22 = sld [smem:[#allocation34_spill]] }
 0x229   : > { %2142 = vmatprep.subr.bf16.mxu1 %v2729_v0 }
 0x22c   : > { %2144 = vmatpush3.bf16.msra.mxu1 %v2143_v38 }
 0x22d   : > { %2145 = vmatprep.subr.bf16.mxu1 %v2729_v0 }
 0x230   : > { %2147 = vmatpush3.bf16.msra.mxu1 %v2146_v46 }
 0x231   : > { %2172 = vmatprep.subr.bf16.mxu1 %v2729_v0 }
 0x2e6   : > { %v864_v40 = vpop.f32.mrb[0].mxu1 }
 0x2e7   : > { %v865_v41 = vadd.f32 %v1624_v39, %v864_v40  ;;  %v1841_v42 = vpop.f32.mrb[1].mxu1  ;;  %v1165_v40 = vld [vmem:[#allocation13 + $0x70] sm:$0xff] }
 0x2e9   : > { %v868_v43 = vmax.f32 %v865_v41, 0.0  ;;  %v1166_v41 = vld [vmem:[#allocation13 + $0x78] sm:$0xff] }
 0x2ea   : > { %v2194_v42 = vpack.c.bf16 %v1166_v41, %v1165_v40 }
 0x2eb   : > { %1875 = vmatmul.mubr.f32.vlgmr.msra.gmra.mrb[2].mxu0 %v868_v43  ;;  %v1245_v43 = vld [vmem:[#allocation14] sm:$0xff] }
 0x2ec   : > { %1944 = vmatprep.mubr.msk.f32.mxu0 %vm2730_vm0, %v2731_v1  ;;  %2150 = vmatpush3.bf16.msra.mxu0 %v2149_v50  ;;  %v2197_v46 = vpack.c.bf16 %v1246_v44, %v1245_v43  ;;  %v1250_v50 = vld [vmem:[#allocation14 + $0x28] sm:$0xff] }
 0x2ed   : > { %2151 = vmatprep.subr.bf16.mxu0 %v2729_v0  ;;  %v2203_v51 = vpack.c.bf16 %v1250_v50, %v1249_v49 }
 0x2f0   : > { %2153 = vmatpush3.bf16.msra.mxu0 %v2152_v52  ;;  %v1251_v52 = vld [vmem:[#allocation14 + $0x30] sm:$0xff] }
 0x2f1   : > { %2154 = vmatprep.subr.bf16.mxu0 %v2729_v0  ;;  %v2206_v54 = vpack.c.bf16 %v1252_v53, %v1251_v52 }
 0x2f4   : > { %2156 = vmatpush3.bf16.msra.mxu0 %v2155_v55  ;;  %v1253_v55 = vld [vmem:[#allocation14 + $0x40] sm:$0xff] }
 0x2f5   : > { %2157 = vmatprep.subr.bf16.mxu0 %v2729_v0  ;;  %v2209_v57 = vpack.c.bf16 %v1254_v56, %v1253_v55 }
 0x2f8   : > { %2159 = vmatpush3.bf16.msra.mxu0 %v2158_v58  ;;  %v1255_v58 = vld [vmem:[#allocation14 + $0x50] sm:$0xff] }
 0x2f9   : > { %2160 = vmatprep.subr.bf16.mxu0 %v2729_v0  ;;  %v2212_v60 = vpack.c.bf16 %v1256_v59, %v1255_v58 }
 0x2fc   : > { %2162 = vmatpush3.bf16.msra.mxu0 %v2161_v61  ;;  %v1257_v61 = vld [vmem:[#allocation14 + $0x60] sm:$0xff] }
 0x2fd   : > { %2163 = vmatprep.subr.bf16.mxu0 %v2729_v0  ;;  %v2215_v63 = vpack.c.bf16 %v1258_v62, %v1257_v61 }
 0x300   : > { %2165 = vmatpush3.bf16.msra.mxu0 %v2164_v2  ;;  %v1627_v2 = vld [vmem:[%s3377_s16] ss:$0 sm:$0xff]  ;;  %s1453_s16 = sshll.u32 %s679_s30, 4  ;;  %s3275_s16 = int_to_ptr.vmem [resolvable:$true] %s1453_s16 }
 0x301   : > { %2166 = vmatprep.subr.bf16.mxu0 %v2729_v0  ;;  %p2641_p2 = scmp.lt.s32.totalorder %s3275_s16, %s2639_s19 }
 0x304   : > { %2168 = vmatpush3.bf16.msra.mxu0 %v2167_v5 }
 0x305   : > { %2169 = vmatprep.subr.bf16.mxu0 %v2729_v0 }
 0x308   : > { %2171 = vmatpush3.bf16.msra.mxu0 %v2170_v13 }
 0x309   : > { %2196 = vmatprep.subr.bf16.mxu0 %v2729_v0 }
 0x3be   : > { %v958_v7 = vpop.f32.mrb[2].mxu0 }
 0x3bf   : > { %v959_v8 = vadd.f32 %v1625_v6, %v958_v7  ;;  %v1876_v9 = vpop.f32.mrb[3].mxu0  ;;  %v1259_v7 = vld [vmem:[#allocation14 + $0x70] sm:$0xff] }
 0x3c1   : > { %v962_v10 = vmax.f32 %v959_v8, 0.0  ;;  %v1260_v8 = vld [vmem:[#allocation14 + $0x78] sm:$0xff] }
 0x3c2   : > { %v2218_v9 = vpack.c.bf16 %v1260_v8, %v1259_v7 }
 0x3c3   : > { %1910 = vmatmul.mubr.f32.vlgmr.msra.gmra.mrb[2].mxu1 %v962_v10  ;;  %v1339_v10 = vld [vmem:[#allocation16] sm:$0xff] }
 0x3c4   : > { %1979 = vmatprep.mubr.msk.f32.mxu1 %vm2730_vm0, %v2731_v1  ;;  %2174 = vmatpush3.bf16.msra.mxu1 %v2173_v17  ;;  %v2221_v13 = vpack.c.bf16 %v1340_v11, %v1339_v10  ;;  %v1344_v17 = vld [vmem:[#allocation16 + $0x28] sm:$0xff] }
 0x3c5   : > { %2175 = vmatprep.subr.bf16.mxu1 %v2729_v0  ;;  %v2227_v18 = vpack.c.bf16 %v1344_v17, %v1343_v16 }
 0x3c8   : > { %2177 = vmatpush3.bf16.msra.mxu1 %v2176_v19  ;;  %v1346_v19 = vld [vmem:[#allocation16 + $0x38] sm:$0xff] }
 0x3c9   : > { %2178 = vmatprep.subr.bf16.mxu1 %v2729_v0 }
 0x3cc   : > { %2180 = vmatpush3.bf16.msra.mxu1 %v2179_v22  ;;  %v1348_v22 = vld [vmem:[#allocation16 + $0x48] sm:$0xff] }
 0x3cd   : > { %2181 = vmatprep.subr.bf16.mxu1 %v2729_v0  ;;  %v2233_v23 = vpack.c.bf16 %v1348_v22, %v1347_v21 }
 0x3d0   : > { %2183 = vmatpush3.bf16.msra.mxu1 %v2182_v25  ;;  %v1350_v25 = vld [vmem:[#allocation16 + $0x58] sm:$0xff] }
 0x3d1   : > { %2184 = vmatprep.subr.bf16.mxu1 %v2729_v0  ;;  %v2236_v26 = vpack.c.bf16 %v1350_v25, %v1349_v24 }
 0x3d4   : > { %2186 = vmatpush3.bf16.msra.mxu1 %v2185_v28  ;;  %v1352_v28 = vld [vmem:[#allocation16 + $0x68] sm:$0xff] }
 0x3d5   : > { %2187 = vmatprep.subr.bf16.mxu1 %v2729_v0  ;;  %v2239_v29 = vpack.c.bf16 %v1352_v28, %v1351_v27 }
 0x3d8   : > { %2189 = vmatpush3.bf16.msra.mxu1 %v2188_v31 }
 0x3d9   : > { %2190 = vmatprep.subr.bf16.mxu1 %v2729_v0 }
 0x3dc   : > { %2192 = vmatpush3.bf16.msra.mxu1 %v2191_v34 }
 0x3dd   : > { %2193 = vmatprep.subr.bf16.mxu1 %v2729_v0 }
 0x3e0   : > { %2195 = vmatpush3.bf16.msra.mxu1 %v2194_v42  ;;  %v1630_v42 = vld [vmem:[%s3380_s22] ss:$0 sm:$0xff] }
 0x3e1   : > { %2220 = vmatprep.subr.bf16.mxu1 %v2729_v0 }
 0x496   : > { %v1052_v36 = vpop.f32.mrb[2].mxu1 }
 0x497   : > { %v1053_v37 = vadd.f32 %v1626_v35, %v1052_v36  ;;  %v1911_v38 = vpop.f32.mrb[3].mxu1  ;;  %v1353_v35 = vld [vmem:[#allocation16 + $0x70] sm:$0xff]  ;;  %v1354_v36 = vld [vmem:[#allocation16 + $0x78] sm:$0xff] }
 0x498   : > { %v1629_v38 = vld [vmem:[%s3379_s4] ss:$0 sm:$0xff]  ;;  %s2634_s4 = scalar_lea.vmem %s3275_s16, 128 }
 0x499   : > { %v1056_v39 = vmax.f32 %v1053_v37, 0.0  ;;  %v2242_v37 = vpack.c.bf16 %v1354_v36, %v1353_v35  ;;  %p2635_p12 = scmp.ne.s32.totalorder %s3275_s16, %s2634_s4  ;;  %p2642_p3 = scmp.lt.s32.totalorder %s2640_s20, %s2634_s4 }
 0x49b   : > { %1945 = vmatmul.mubr.f32.vlgmr.msra.gmra.mrb[4].mxu0 %v1056_v39  ;;  %p2636_p13 = pnand %p2635_p12, %p3382_p1  ;;  %p2643_p9 = por %p2642_p3, %p2641_p2 }
 0x49c   : > { %2014 = vmatprep.mubr.msk.f32.mxu0 %vm2730_vm0, %v2731_v1  ;;  %2198 = vmatpush3.bf16.msra.mxu0 %v2197_v46 }
 0x49d   : > { %2199 = vmatprep.subr.bf16.mxu0 %v2729_v0  ;;  %p2637_p0 = pneg %p2636_p13 }
 0x49f   : > { %p2644_p10 = pnand %p2643_p9, %p2637_p0 }
 0x4a0   : > { %2201 = vmatpush3.bf16.msra.mxu0 %v2200_v48 }
 0x4a1   : > { %2202 = vmatprep.subr.bf16.mxu0 %v2729_v0 }
 0x4a4   : > { %2204 = vmatpush3.bf16.msra.mxu0 %v2203_v51 }
 0x4a5   : > { %2205 = vmatprep.subr.bf16.mxu0 %v2729_v0 }
 0x4a8   : > { %2207 = vmatpush3.bf16.msra.mxu0 %v2206_v54 }
 0x4a9   : > { %2208 = vmatprep.subr.bf16.mxu0 %v2729_v0 }
 0x4ac   : > { %2210 = vmatpush3.bf16.msra.mxu0 %v2209_v57 }
 0x4ad   : > { %2211 = vmatprep.subr.bf16.mxu0 %v2729_v0 }
 0x4b0   : > { %2213 = vmatpush3.bf16.msra.mxu0 %v2212_v60 }
 0x4b1   : > { %2214 = vmatprep.subr.bf16.mxu0 %v2729_v0 }
 0x4b4   : > { %2216 = vmatpush3.bf16.msra.mxu0 %v2215_v63 }
 0x4b5   : > { %2217 = vmatprep.subr.bf16.mxu0 %v2729_v0 }
 0x4b8   : > { %2219 = vmatpush3.bf16.msra.mxu0 %v2218_v9 }
 0x56e   : > { %v1146_v3 = vpop.f32.mrb[4].mxu0 }
 0x56f   : > { %v1147_v4 = vadd.f32 %v1627_v2, %v1146_v3  ;;  %v1946_v5 = vpop.f32.mrb[5].mxu0 }
 0x571   : > { %v1150_v6 = vmax.f32 %v1147_v4, 0.0 }
 0x573   : > { %1980 = vmatmul.mubr.f32.vlgmr.msra.gmra.mrb[4].mxu1 %v1150_v6 }
 0x574   : > { %2049 = vmatprep.mubr.msk.f32.mxu1 %vm2730_vm0, %v2731_v1  ;;  %2222 = vmatpush3.bf16.msra.mxu1 %v2221_v13  ;;  %v1345_v1 = vld [vmem:[#allocation16 + $0x30] sm:$0xff] }
 0x575   : > { %2223 = vmatprep.subr.bf16.mxu1 %v2729_v0  ;;  %v2230_v20 = vpack.c.bf16 %v1346_v19, %v1345_v1 }
 0x578   : > { %2225 = vmatpush3.bf16.msra.mxu1 %v2224_v15 }
 0x579   : > { %2226 = vmatprep.subr.bf16.mxu1 %v2729_v0 }
 0x57c   : > { %2228 = vmatpush3.bf16.msra.mxu1 %v2227_v18 }
 0x57d   : > { %2229 = vmatprep.subr.bf16.mxu1 %v2729_v0 }
 0x580   : > { %2231 = vmatpush3.bf16.msra.mxu1 %v2230_v20 }
 0x581   : > { %2232 = vmatprep.subr.bf16.mxu1 %v2729_v0 }
 0x584   : > { %2234 = vmatpush3.bf16.msra.mxu1 %v2233_v23 }
 0x585   : > { %2235 = vmatprep.subr.bf16.mxu1 %v2729_v0 }
 0x588   : > { %2237 = vmatpush3.bf16.msra.mxu1 %v2236_v26 }
 0x589   : > { %2238 = vmatprep.subr.bf16.mxu1 %v2729_v0 }
 0x58c   : > { %2240 = vmatpush3.bf16.msra.mxu1 %v2239_v29 }
 0x58d   : > { %2241 = vmatprep.subr.bf16.mxu1 %v2729_v0 }
 0x590   : > { %2243 = vmatpush3.bf16.msra.mxu1 %v2242_v37 }
 0x646   : > { %v1240_v31 = vpop.f32.mrb[4].mxu1 }
 0x647   : > { %v1241_v32 = vadd.f32 %v1628_v30, %v1240_v31  ;;  %v1981_v33 = vpop.f32.mrb[5].mxu1 }
 0x649   : > { %v1244_v34 = vmax.f32 %v1241_v32, 0.0 }
 0x64b   : > { %2015 = vmatmul.mubr.f32.vlgmr.msra.gmra.mrb[6].mxu0 %v1244_v34 }
 0x71e   : > { %v1334_v0 = vpop.f32.mrb[6].mxu0 }
 0x71f   : > { %v1335_v39 = vadd.f32 %v1629_v38, %v1334_v0  ;;  %v2016_v40 = vpop.f32.mrb[7].mxu0 }
 0x721   : > { %v1338_v41 = vmax.f32 %v1335_v39, 0.0 }
 0x723   : > { %2050 = vmatmul.mubr.f32.vlgmr.msra.gmra.mrb[6].mxu1 %v1338_v41 }
 0x7f6   : > { %v1428_v43 = vpop.f32.mrb[6].mxu1 }
 0x7f7   : > { %v1429_v44 = vadd.f32 %v1630_v42, %v1428_v43  ;;  %v2051_v45 = vpop.f32.mrb[7].mxu1 }
 0x7f9   : > { %v1631_v46 = vmul.f32 -1.442695, %v1429_v44 }
 0x7fb   : > { %2376 = vpow2.f32 %v1631_v46 }
 0x805   : > { %v2377_v47 = vpop.eup %2376 }
 0x806   : > { %v1435_v48 = vadd.f32 1.0, %v2377_v47 }
 0x808   : > { %2378 = vrcp.f32 %v1435_v48 }
 0x812   : > { %v2379_v49 = vpop.eup %2378 }
 0x813   : > { %1438 = vst [vmem:[%s679_s30] sm:$0xff] %v2379_v49 }
 0x814   : > { %2647 = shalt.err (!%p2644_p10)
}
 0x815   : > { %s2648_s3 = scalar_lea.hbm %s3273_s21, 128  ;;  %s2652_s29 = scalar_lea.hbm %s3381_s17, 1024 }
 0x816   : > { %p2649_p11 = scmp.ne.s32.totalorder %s3273_s21, %s2648_s3  ;;  %p2653_p6 = scmp.lt.u32.totalorder %s3273_s21, %s3381_s17 }
 0x817   : > { %p2654_p5 = scmp.lt.u32.totalorder %s2652_s29, %s2648_s3  ;;  %p2656_p12 = scmp.lt.u32.totalorder %s2648_s3, %s3273_s21 }
 0x818   : > { %p2650_p7 = pnand %p2649_p11, %p3382_p1 }
 0x819   : > { %p2655_p8 = por %p2654_p5, %p2653_p6 }
 0x81a   : > { %p2651_p4 = pneg %p2650_p7 }
 0x81b   : > { %p2657_p13 = por %p2656_p12, %p2655_p8 }
 0x81d   : > { %p2658_p0 = pnand %p2657_p13, %p2651_p4 }
 0x81f   : > { %2661 = shalt.err (!%p2658_p0)
}
 0x820   : > { %2278 = dma.vmem_to_hbm [thread:$0]  (%p3382_p1), %s3275_s16, 128, %s3273_s21, %s1440_s12  }
 0x821 PF: > { %p2330_p2 = scmp.ge.s32.totalorder %s2716_s27, 2  ;;  %s1465_s1 = sand.u32 1, %s2704_s24  }
 0x822   : > { %p3383_p3 = scmp.ne.s32.totalorder %s3362_s23, 0  ;;  %s1466_s4 = scalar_lea.sflag [#allocation4], %s1465_s1 }
 0x824   : > { %p2310_p9 = pnand %p2330_p2, %p3383_p3 }
 0x826   : > { %2699 = dma.done.wait (!%p2310_p9), %s1466_s4, 128  }
 0x827   : > { %2701 = vsyncadd (!%p2310_p9), %s1466_s4, 4294967168  ;;  %p34_p10 = scmp.ge.s32.totalorder %s3058_s18, 10   ;;  %s3384_s24 = smov %s2708_s25 }
 0x828   : > { %s3385_s25 = smov %s2712_s26  ;;  %s3386_s26 = smov %s3069_s6 }
 0x829   : > { %s3387_s27 = smov %s3058_s18  ;;  %36 = sbr.rel (!%p34_p10) target bundleno = 22 (0x16), region = 165 }
 0x830   :  { %1471 = vsyncpa [#allocation3], 1 }
 0x831   :  { %1473 = vsyncpa [#allocation3 + $0x1], 1 }
 0x832   :  { %1474 = vsyncpa [#allocation6], 1 }
 0x833   :  { %1475 = vsyncpa [#allocation9], 1 }
 0x834   :  { %1476 = vsyncpa [#allocation12], 1 }
 0x835   :  { %1477 = vsyncpa [#allocation15], 1 }
 0x836   :  { %1478 = vsyncpa [#allocation4], 1 }
 0x837   :  { %1480 = vsyncpa [#allocation4 + $0x1], 1 }

</bundles_post_ra>
